<compile_context>
chip_gen: v5e
topology: v5e:2x2
jax: 0.10.0
libtpu: 0.0.40
codegen_flags: <defaults>
</compile_context>

<pallas_src>
import functools
import math

import jax
import jax.numpy as jnp
from jax.experimental import pallas as pl
from jax.experimental.pallas import tpu as pltpu


def _mh_attn_kernel(x_ref, wqkv_ref, wz_ref, bz_ref, out_ref, *, num_heads):
    """One grid step = one batch tile, ALL heads.

    Shapes seen by the kernel:
      x_ref    : (TB, T, D)        input tile
      wqkv_ref : (D, 3*H*D)        fused [q|k|v] x [head] x [out] projection
                                   (1/sqrt(D) pre-folded into the Q columns)
      wz_ref   : (H*D, D)          Wz.T (per-head row blocks)
      bz_ref   : (1, D)            Wz bias
      out_ref  : (TB, T, D)
    """
    tb, T, D = x_ref.shape
    HD = num_heads * D

    # Single fused QKV projection: one MXU push with N = 3*H*D.
    x2 = x_ref[...].reshape(tb * T, D)                               # (TB*T, D)
    qkv = jnp.dot(x2, wqkv_ref[...],
                  preferred_element_type=jnp.float32)                # (TB*T, 3*H*D)
    # Feed the MXU in the input dtype for the downstream matmuls (no-op for f32).
    qkv = qkv.astype(x_ref.dtype)

    acc = jnp.zeros((tb * T, D), jnp.float32)                        # f32 accumulator

    # H is small & static; an unrolled head loop over 3-D batched einsums keeps
    # every op in a well-supported Mosaic form.
    for h in range(num_heads):
        q = qkv[:, 0 * HD + h * D: 0 * HD + (h + 1) * D].reshape(tb, T, D)
        k = qkv[:, 1 * HD + h * D: 1 * HD + (h + 1) * D].reshape(tb, T, D)
        v = qkv[:, 2 * HD + h * D: 2 * HD + (h + 1) * D].reshape(tb, T, D)

        # Scaled dot-product attention (scale already folded into q's weights).
        s = jnp.einsum('bqd,bkd->bqk', q, k,
                       preferred_element_type=jnp.float32)           # (TB, T, T)
        m = jnp.max(s, axis=-1, keepdims=True)
        e = jnp.exp(s - m)
        l = jnp.sum(e, axis=-1, keepdims=True)
        # Reciprocal on the (TB,T,1) sums + multiply instead of a (TB,T,T) divide.
        # (approx=True would push it to the EUP; kept exact to match reference.)
        p = e * pl.reciprocal(l, approx=False)

        z = jnp.einsum('bqk,bkd->bqd', p.astype(x_ref.dtype), v,
                       preferred_element_type=jnp.float32)           # (TB, T, D)

        # Per-head slice of the output projection (concat-free Wz).
        acc = acc + jnp.dot(z.reshape(tb * T, D).astype(wz_ref.dtype),
                            wz_ref[h * D:(h + 1) * D, :],
                            preferred_element_type=jnp.float32)

    out = acc + bz_ref[...].astype(jnp.float32)                      # bias broadcast
    out_ref[...] = out.reshape(tb, T, D).astype(out_ref.dtype)       # single store


def _pick_batch_tile(B, T, D, H, x_itemsize, w_itemsize,
                     budget_bytes=24 * 1024 * 1024):
    """Largest power-of-2 divisor of B whose VMEM footprint fits the budget."""
    # Resident weights (conservatively assume double-buffered).
    weight_bytes = (3 * H * D * D + H * D * D + D) * w_itemsize * 2
    budget = max(budget_bytes - weight_bytes, 1)
    # Per-batch-element bytes: double-buffered X/out tiles + f32 intermediates
    # (qkv, q/k/v/z slices, s/e/p score tensors, accumulator).
    per_b = (2 * T * D * x_itemsize * 2
             + 4 * (3 * H * T * D + 4 * T * D + 3 * T * T + T * D))
    tb_max = max(1, budget // per_b)
    # Amortize ~0.35us/step overhead but keep rows/step bounded.
    tb_max = min(tb_max, max(1, 2048 // max(T, 1)))
    # v7x has 2 TensorCores; only the "parallel" batch axis is shardable.
    if B >= 2:
        tb_max = min(tb_max, B // 2)
    tb = 1
    while tb * 2 <= tb_max and B % (tb * 2) == 0:
        tb *= 2
    return tb


def mh_self_attention(X, Wq, Wk, Wv, Wz_weight, Wz_bias, *, batch_tile=None):
    """Pallas implementation of MH_SelfAttention.forward.

    Args:
      X        : (B, T, D)  batch, similarity-type tokens, feature dim.
      Wq/Wk/Wv : (H, D, D)  per-head torch nn.Linear weights (out, in), no bias.
      Wz_weight: (D, H*D)   torch nn.Linear weight (out, in).
      Wz_bias  : (D,)
    Returns:
      (B, T, D) output of the multi-head block.
    """
    B, T, D = X.shape
    H = Wq.shape[0]
    assert Wq.shape == (H, D, D) and Wk.shape == (H, D, D) and Wv.shape == (H, D, D)
    assert Wz_weight.shape == (D, H * D) and Wz_bias.shape == (D,)

    # --- plain-JAX glue: torch (out, in) -> (in, out), fuse QKV, fold the scale ---
    scale = 1.0 / math.sqrt(float(D))          # D^{-1/4} on q and k == D^{-1/2} on q
    Wq_t = jnp.swapaxes(Wq, -1, -2) * jnp.asarray(scale, Wq.dtype)   # (H, D, D)
    Wk_t = jnp.swapaxes(Wk, -1, -2)
    Wv_t = jnp.swapaxes(Wv, -1, -2)
    # (3, H, D_in, D_out) -> (D_in, 3, H, D_out) -> (D, 3*H*D); columns = [part, head, out]
    Wqkv = jnp.transpose(jnp.stack([Wq_t, Wk_t, Wv_t], axis=0),
                         (2, 0, 1, 3)).reshape(D, 3 * H * D)
    Wz_t = Wz_weight.T                          # (H*D, D); rows h*D:(h+1)*D = head h
    bz = Wz_bias.reshape(1, D)

    if batch_tile is None:
        tb = _pick_batch_tile(B, T, D, H, X.dtype.itemsize, Wqkv.dtype.itemsize)
    else:
        assert B % batch_tile == 0
        tb = batch_tile

    grid = (B // tb,)
    kernel = functools.partial(_mh_attn_kernel, num_heads=H)

    flops = B * H * (8 * T * D * D + 4 * T * T * D)
    bytes_accessed = (2 * B * T * D) * X.dtype.itemsize \
        + (3 * H * D * D + H * D * D + D) * Wqkv.dtype.itemsize

    out = pl.pallas_call(
        kernel,
        out_shape=jax.ShapeDtypeStruct((B, T, D), X.dtype),
        grid=grid,
        in_specs=[
            pl.BlockSpec((tb, T, D), lambda b: (b, 0, 0)),        # X tile
            pl.BlockSpec((D, 3 * H * D), lambda b: (0, 0)),       # fused Wqkv (resident)
            pl.BlockSpec((H * D, D), lambda b: (0, 0)),           # Wz.T (resident)
            pl.BlockSpec((1, D), lambda b: (0, 0)),               # bias (resident)
        ],
        out_specs=pl.BlockSpec((tb, T, D), lambda b: (b, 0, 0)),
        compiler_params=pltpu.CompilerParams(
            dimension_semantics=("parallel",),
            vmem_limit_bytes=48 * 1024 * 1024),
        cost_estimate=pl.CostEstimate(
            flops=int(flops),
            transcendentals=int(B * H * T * T),
            bytes_accessed=int(bytes_accessed)),
    )(X, Wqkv, Wz_t, bz)
    return out


if __name__ == "__main__":
    key = jax.random.PRNGKey(0)
    kx, kq, kk, kv, kw, kb = jax.random.split(key, 6)

    B, T, D, H = 2, 8, 32, 4
    X = jax.random.normal(kx, (B, T, D), jnp.float32)
    Wq = jax.random.normal(kq, (H, D, D), jnp.float32) / math.sqrt(D)
    Wk = jax.random.normal(kk, (H, D, D), jnp.float32) / math.sqrt(D)
    Wv = jax.random.normal(kv, (H, D, D), jnp.float32) / math.sqrt(D)
    Wz_weight = jax.random.normal(kw, (D, H * D), jnp.float32) / math.sqrt(H * D)
    Wz_bias = jax.random.normal(kb, (D,), jnp.float32) * 0.1

    out = mh_self_attention(X, Wq, Wk, Wv, Wz_weight, Wz_bias)
    out = jax.block_until_ready(out)

    # Pure-JAX reference with identical torch semantics.
    def ref(X):
        denom = float(D) ** 0.25
        zs = []
        for h in range(H):
            q = (X @ Wq[h].T) / denom
            k = (X @ Wk[h].T) / denom
            v = X @ Wv[h].T
            s = jnp.einsum('btd,bsd->bts', q, k)
            p = jax.nn.softmax(s, axis=-1)
            zs.append(jnp.einsum('bts,bsd->btd', p, v))
        z = jnp.concatenate(zs, axis=-1)
        return z @ Wz_weight.T + Wz_bias

    expected = ref(X)
    assert out.shape == (B, T, D)
    max_err = float(jnp.max(jnp.abs(out - expected)))
    assert jnp.allclose(out, expected, atol=1e-4, rtol=1e-4), f"mismatch {max_err}"
    print("KERNEL_OK")
</pallas_src>

<mosaic_0001>
module attributes {stable_mosaic.version = 11 : i64} {
  func.func @_mh_attn_kernel(%arg0: i32, %arg1: memref<1x8x32xf32, #tpu.memory_space<vmem>>, %arg2: memref<32x384xf32, #tpu.memory_space<vmem>>, %arg3: memref<128x32xf32, #tpu.memory_space<vmem>>, %arg4: memref<1x32xf32, #tpu.memory_space<vmem>>, %arg5: memref<1x8x32xf32, #tpu.memory_space<vmem>>) attributes {dimension_semantics = [#tpu.dimension_semantics<parallel>], iteration_bounds = array<i64: 2>, scalar_prefetch = 0 : i64, scratch_operands = 0 : i64, tpu.core_type = #tpu.core_type<tc>, window_params = [{transform_indices = @transform_0, window_bounds = array<i64: 1, 8, 32>}, {pipeline_mode = #tpu.pipeline_mode<synchronous>, transform_indices = @transform_1, window_bounds = array<i64: 32, 384>}, {pipeline_mode = #tpu.pipeline_mode<synchronous>, transform_indices = @transform_2, window_bounds = array<i64: 128, 32>}, {pipeline_mode = #tpu.pipeline_mode<synchronous>, transform_indices = @transform_3, window_bounds = array<i64: 1, 32>}, {transform_indices = @transform_4, window_bounds = array<i64: 1, 8, 32>}]} {
    %c0 = arith.constant 0 : index
    %c0_0 = arith.constant 0 : index
    %c0_1 = arith.constant 0 : index
    %0 = vector.load %arg1[%c0, %c0_0, %c0_1] : memref<1x8x32xf32, #tpu.memory_space<vmem>>, vector<1x8x32xf32>
    %1 = vector.shape_cast %0 : vector<1x8x32xf32> to vector<8x32xf32>
    %c0_2 = arith.constant 0 : index
    %c0_3 = arith.constant 0 : index
    %2 = vector.load %arg2[%c0_2, %c0_3] : memref<32x384xf32, #tpu.memory_space<vmem>>, vector<32x384xf32>
    %cst = arith.constant dense<0.000000e+00> : vector<8x384xf32>
    %3 = tpu.matmul %1, %2, %cst {dimension_numbers = #tpu.dot_dimension_numbers<[1], [0], [0], [1], [0, 0, 1, 1], [], []>} : vector<8x32xf32>, vector<32x384xf32>, vector<8x384xf32> -> vector<8x384xf32>
    %cst_4 = arith.constant 0.000000e+00 : f32
    %4 = vector.broadcast %cst_4 : f32 to vector<8x32xf32>
    %5 = vector.extract_strided_slice %3 {offsets = [0, 0], sizes = [8, 32], strides = [1, 1]} : vector<8x384xf32> to vector<8x32xf32>
    %6 = vector.shape_cast %5 : vector<8x32xf32> to vector<1x8x32xf32>
    %7 = vector.extract_strided_slice %3 {offsets = [0, 128], sizes = [8, 32], strides = [1, 1]} : vector<8x384xf32> to vector<8x32xf32>
    %8 = vector.shape_cast %7 : vector<8x32xf32> to vector<1x8x32xf32>
    %9 = vector.extract_strided_slice %3 {offsets = [0, 256], sizes = [8, 32], strides = [1, 1]} : vector<8x384xf32> to vector<8x32xf32>
    %10 = vector.shape_cast %9 : vector<8x32xf32> to vector<1x8x32xf32>
    "tpu.trace_start"() <{level = 10 : i32, message = "bqd,bkd->bqk"}> : () -> ()
    %cst_5 = arith.constant dense<0.000000e+00> : vector<1x8x8xf32>
    %11 = tpu.matmul %6, %8, %cst_5 {dimension_numbers = #tpu.dot_dimension_numbers<[2], [2], [1], [1], [0, 0, 0, 1, 1, 1], [0], [0]>} : vector<1x8x32xf32>, vector<1x8x32xf32>, vector<1x8x8xf32> -> vector<1x8x8xf32>
    "tpu.trace_stop"() : () -> ()
    %cst_6 = arith.constant dense<0xFF800000> : vector<1x8xf32>
    %12 = vector.multi_reduction <maximumf>, %11, %cst_6 [2] : vector<1x8x8xf32> to vector<1x8xf32>
    %13 = vector.shape_cast %12 : vector<1x8xf32> to vector<1x8x1xf32>
    %14 = vector.broadcast %13 : vector<1x8x1xf32> to vector<1x8x8xf32>
    %15 = arith.subf %11, %14 : vector<1x8x8xf32>
    %16 = math.exp %15 : vector<1x8x8xf32>
    %cst_7 = arith.constant dense<0.000000e+00> : vector<1x8xf32>
    %17 = vector.multi_reduction <add>, %16, %cst_7 [2] : vector<1x8x8xf32> to vector<1x8xf32>
    %18 = vector.shape_cast %17 : vector<1x8xf32> to vector<1x8x1xf32>
    %19 = tpu.reciprocal %18 : vector<1x8x1xf32> -> vector<1x8x1xf32>
    %20 = vector.broadcast %19 : vector<1x8x1xf32> to vector<1x8x8xf32>
    %21 = arith.mulf %16, %20 : vector<1x8x8xf32>
    "tpu.trace_start"() <{level = 10 : i32, message = "bqk,bkd->bqd"}> : () -> ()
    %cst_8 = arith.constant dense<0.000000e+00> : vector<1x8x32xf32>
    %22 = tpu.matmul %21, %10, %cst_8 {dimension_numbers = #tpu.dot_dimension_numbers<[2], [1], [1], [2], [0, 0, 0, 1, 1, 2], [0], [0]>} : vector<1x8x8xf32>, vector<1x8x32xf32>, vector<1x8x32xf32> -> vector<1x8x32xf32>
    "tpu.trace_stop"() : () -> ()
    %23 = vector.shape_cast %22 : vector<1x8x32xf32> to vector<8x32xf32>
    %c0_9 = arith.constant 0 : index
    %c0_10 = arith.constant 0 : index
    %24 = vector.load %arg3[%c0_9, %c0_10] : memref<128x32xf32, #tpu.memory_space<vmem>>, vector<32x32xf32>
    %cst_11 = arith.constant dense<0.000000e+00> : vector<8x32xf32>
    %25 = tpu.matmul %23, %24, %cst_11 {dimension_numbers = #tpu.dot_dimension_numbers<[1], [0], [0], [1], [0, 0, 1, 1], [], []>} : vector<8x32xf32>, vector<32x32xf32>, vector<8x32xf32> -> vector<8x32xf32>
    %26 = arith.addf %4, %25 : vector<8x32xf32>
    %27 = vector.extract_strided_slice %3 {offsets = [0, 32], sizes = [8, 32], strides = [1, 1]} : vector<8x384xf32> to vector<8x32xf32>
    %28 = vector.shape_cast %27 : vector<8x32xf32> to vector<1x8x32xf32>
    %29 = vector.extract_strided_slice %3 {offsets = [0, 160], sizes = [8, 32], strides = [1, 1]} : vector<8x384xf32> to vector<8x32xf32>
    %30 = vector.shape_cast %29 : vector<8x32xf32> to vector<1x8x32xf32>
    %31 = vector.extract_strided_slice %3 {offsets = [0, 288], sizes = [8, 32], strides = [1, 1]} : vector<8x384xf32> to vector<8x32xf32>
    %32 = vector.shape_cast %31 : vector<8x32xf32> to vector<1x8x32xf32>
    "tpu.trace_start"() <{level = 10 : i32, message = "bqd,bkd->bqk"}> : () -> ()
    %cst_12 = arith.constant dense<0.000000e+00> : vector<1x8x8xf32>
    %33 = tpu.matmul %28, %30, %cst_12 {dimension_numbers = #tpu.dot_dimension_numbers<[2], [2], [1], [1], [0, 0, 0, 1, 1, 1], [0], [0]>} : vector<1x8x32xf32>, vector<1x8x32xf32>, vector<1x8x8xf32> -> vector<1x8x8xf32>
    "tpu.trace_stop"() : () -> ()
    %cst_13 = arith.constant dense<0xFF800000> : vector<1x8xf32>
    %34 = vector.multi_reduction <maximumf>, %33, %cst_13 [2] : vector<1x8x8xf32> to vector<1x8xf32>
    %35 = vector.shape_cast %34 : vector<1x8xf32> to vector<1x8x1xf32>
    %36 = vector.broadcast %35 : vector<1x8x1xf32> to vector<1x8x8xf32>
    %37 = arith.subf %33, %36 : vector<1x8x8xf32>
    %38 = math.exp %37 : vector<1x8x8xf32>
    %cst_14 = arith.constant dense<0.000000e+00> : vector<1x8xf32>
    %39 = vector.multi_reduction <add>, %38, %cst_14 [2] : vector<1x8x8xf32> to vector<1x8xf32>
    %40 = vector.shape_cast %39 : vector<1x8xf32> to vector<1x8x1xf32>
    %41 = tpu.reciprocal %40 : vector<1x8x1xf32> -> vector<1x8x1xf32>
    %42 = vector.broadcast %41 : vector<1x8x1xf32> to vector<1x8x8xf32>
    %43 = arith.mulf %38, %42 : vector<1x8x8xf32>
    "tpu.trace_start"() <{level = 10 : i32, message = "bqk,bkd->bqd"}> : () -> ()
    %cst_15 = arith.constant dense<0.000000e+00> : vector<1x8x32xf32>
    %44 = tpu.matmul %43, %32, %cst_15 {dimension_numbers = #tpu.dot_dimension_numbers<[2], [1], [1], [2], [0, 0, 0, 1, 1, 2], [0], [0]>} : vector<1x8x8xf32>, vector<1x8x32xf32>, vector<1x8x32xf32> -> vector<1x8x32xf32>
    "tpu.trace_stop"() : () -> ()
    %45 = vector.shape_cast %44 : vector<1x8x32xf32> to vector<8x32xf32>
    %c32 = arith.constant 32 : index
    %c0_16 = arith.constant 0 : index
    %46 = vector.load %arg3[%c32, %c0_16] : memref<128x32xf32, #tpu.memory_space<vmem>>, vector<32x32xf32>
    %cst_17 = arith.constant dense<0.000000e+00> : vector<8x32xf32>
    %47 = tpu.matmul %45, %46, %cst_17 {dimension_numbers = #tpu.dot_dimension_numbers<[1], [0], [0], [1], [0, 0, 1, 1], [], []>} : vector<8x32xf32>, vector<32x32xf32>, vector<8x32xf32> -> vector<8x32xf32>
    %48 = arith.addf %26, %47 : vector<8x32xf32>
    %49 = vector.extract_strided_slice %3 {offsets = [0, 64], sizes = [8, 32], strides = [1, 1]} : vector<8x384xf32> to vector<8x32xf32>
    %50 = vector.shape_cast %49 : vector<8x32xf32> to vector<1x8x32xf32>
    %51 = vector.extract_strided_slice %3 {offsets = [0, 192], sizes = [8, 32], strides = [1, 1]} : vector<8x384xf32> to vector<8x32xf32>
    %52 = vector.shape_cast %51 : vector<8x32xf32> to vector<1x8x32xf32>
    %53 = vector.extract_strided_slice %3 {offsets = [0, 320], sizes = [8, 32], strides = [1, 1]} : vector<8x384xf32> to vector<8x32xf32>
    %54 = vector.shape_cast %53 : vector<8x32xf32> to vector<1x8x32xf32>
    "tpu.trace_start"() <{level = 10 : i32, message = "bqd,bkd->bqk"}> : () -> ()
    %cst_18 = arith.constant dense<0.000000e+00> : vector<1x8x8xf32>
    %55 = tpu.matmul %50, %52, %cst_18 {dimension_numbers = #tpu.dot_dimension_numbers<[2], [2], [1], [1], [0, 0, 0, 1, 1, 1], [0], [0]>} : vector<1x8x32xf32>, vector<1x8x32xf32>, vector<1x8x8xf32> -> vector<1x8x8xf32>
    "tpu.trace_stop"() : () -> ()
    %cst_19 = arith.constant dense<0xFF800000> : vector<1x8xf32>
    %56 = vector.multi_reduction <maximumf>, %55, %cst_19 [2] : vector<1x8x8xf32> to vector<1x8xf32>
    %57 = vector.shape_cast %56 : vector<1x8xf32> to vector<1x8x1xf32>
    %58 = vector.broadcast %57 : vector<1x8x1xf32> to vector<1x8x8xf32>
    %59 = arith.subf %55, %58 : vector<1x8x8xf32>
    %60 = math.exp %59 : vector<1x8x8xf32>
    %cst_20 = arith.constant dense<0.000000e+00> : vector<1x8xf32>
    %61 = vector.multi_reduction <add>, %60, %cst_20 [2] : vector<1x8x8xf32> to vector<1x8xf32>
    %62 = vector.shape_cast %61 : vector<1x8xf32> to vector<1x8x1xf32>
    %63 = tpu.reciprocal %62 : vector<1x8x1xf32> -> vector<1x8x1xf32>
    %64 = vector.broadcast %63 : vector<1x8x1xf32> to vector<1x8x8xf32>
    %65 = arith.mulf %60, %64 : vector<1x8x8xf32>
    "tpu.trace_start"() <{level = 10 : i32, message = "bqk,bkd->bqd"}> : () -> ()
    %cst_21 = arith.constant dense<0.000000e+00> : vector<1x8x32xf32>
    %66 = tpu.matmul %65, %54, %cst_21 {dimension_numbers = #tpu.dot_dimension_numbers<[2], [1], [1], [2], [0, 0, 0, 1, 1, 2], [0], [0]>} : vector<1x8x8xf32>, vector<1x8x32xf32>, vector<1x8x32xf32> -> vector<1x8x32xf32>
    "tpu.trace_stop"() : () -> ()
    %67 = vector.shape_cast %66 : vector<1x8x32xf32> to vector<8x32xf32>
    %c64 = arith.constant 64 : index
    %c0_22 = arith.constant 0 : index
    %68 = vector.load %arg3[%c64, %c0_22] : memref<128x32xf32, #tpu.memory_space<vmem>>, vector<32x32xf32>
    %cst_23 = arith.constant dense<0.000000e+00> : vector<8x32xf32>
    %69 = tpu.matmul %67, %68, %cst_23 {dimension_numbers = #tpu.dot_dimension_numbers<[1], [0], [0], [1], [0, 0, 1, 1], [], []>} : vector<8x32xf32>, vector<32x32xf32>, vector<8x32xf32> -> vector<8x32xf32>
    %70 = arith.addf %48, %69 : vector<8x32xf32>
    %71 = vector.extract_strided_slice %3 {offsets = [0, 96], sizes = [8, 32], strides = [1, 1]} : vector<8x384xf32> to vector<8x32xf32>
    %72 = vector.shape_cast %71 : vector<8x32xf32> to vector<1x8x32xf32>
    %73 = vector.extract_strided_slice %3 {offsets = [0, 224], sizes = [8, 32], strides = [1, 1]} : vector<8x384xf32> to vector<8x32xf32>
    %74 = vector.shape_cast %73 : vector<8x32xf32> to vector<1x8x32xf32>
    %75 = vector.extract_strided_slice %3 {offsets = [0, 352], sizes = [8, 32], strides = [1, 1]} : vector<8x384xf32> to vector<8x32xf32>
    %76 = vector.shape_cast %75 : vector<8x32xf32> to vector<1x8x32xf32>
    "tpu.trace_start"() <{level = 10 : i32, message = "bqd,bkd->bqk"}> : () -> ()
    %cst_24 = arith.constant dense<0.000000e+00> : vector<1x8x8xf32>
    %77 = tpu.matmul %72, %74, %cst_24 {dimension_numbers = #tpu.dot_dimension_numbers<[2], [2], [1], [1], [0, 0, 0, 1, 1, 1], [0], [0]>} : vector<1x8x32xf32>, vector<1x8x32xf32>, vector<1x8x8xf32> -> vector<1x8x8xf32>
    "tpu.trace_stop"() : () -> ()
    %cst_25 = arith.constant dense<0xFF800000> : vector<1x8xf32>
    %78 = vector.multi_reduction <maximumf>, %77, %cst_25 [2] : vector<1x8x8xf32> to vector<1x8xf32>
    %79 = vector.shape_cast %78 : vector<1x8xf32> to vector<1x8x1xf32>
    %80 = vector.broadcast %79 : vector<1x8x1xf32> to vector<1x8x8xf32>
    %81 = arith.subf %77, %80 : vector<1x8x8xf32>
    %82 = math.exp %81 : vector<1x8x8xf32>
    %cst_26 = arith.constant dense<0.000000e+00> : vector<1x8xf32>
    %83 = vector.multi_reduction <add>, %82, %cst_26 [2] : vector<1x8x8xf32> to vector<1x8xf32>
    %84 = vector.shape_cast %83 : vector<1x8xf32> to vector<1x8x1xf32>
    %85 = tpu.reciprocal %84 : vector<1x8x1xf32> -> vector<1x8x1xf32>
    %86 = vector.broadcast %85 : vector<1x8x1xf32> to vector<1x8x8xf32>
    %87 = arith.mulf %82, %86 : vector<1x8x8xf32>
    "tpu.trace_start"() <{level = 10 : i32, message = "bqk,bkd->bqd"}> : () -> ()
    %cst_27 = arith.constant dense<0.000000e+00> : vector<1x8x32xf32>
    %88 = tpu.matmul %87, %76, %cst_27 {dimension_numbers = #tpu.dot_dimension_numbers<[2], [1], [1], [2], [0, 0, 0, 1, 1, 2], [0], [0]>} : vector<1x8x8xf32>, vector<1x8x32xf32>, vector<1x8x32xf32> -> vector<1x8x32xf32>
    "tpu.trace_stop"() : () -> ()
    %89 = vector.shape_cast %88 : vector<1x8x32xf32> to vector<8x32xf32>
    %c96 = arith.constant 96 : index
    %c0_28 = arith.constant 0 : index
    %90 = vector.load %arg3[%c96, %c0_28] : memref<128x32xf32, #tpu.memory_space<vmem>>, vector<32x32xf32>
    %cst_29 = arith.constant dense<0.000000e+00> : vector<8x32xf32>
    %91 = tpu.matmul %89, %90, %cst_29 {dimension_numbers = #tpu.dot_dimension_numbers<[1], [0], [0], [1], [0, 0, 1, 1], [], []>} : vector<8x32xf32>, vector<32x32xf32>, vector<8x32xf32> -> vector<8x32xf32>
    %92 = arith.addf %70, %91 : vector<8x32xf32>
    %c0_30 = arith.constant 0 : index
    %c0_31 = arith.constant 0 : index
    %93 = vector.load %arg4[%c0_30, %c0_31] : memref<1x32xf32, #tpu.memory_space<vmem>>, vector<1x32xf32>
    %94 = vector.broadcast %93 : vector<1x32xf32> to vector<8x32xf32>
    %95 = arith.addf %92, %94 : vector<8x32xf32>
    %96 = vector.shape_cast %95 : vector<8x32xf32> to vector<1x8x32xf32>
    %c0_32 = arith.constant 0 : index
    %c0_33 = arith.constant 0 : index
    %c0_34 = arith.constant 0 : index
    %97 = vector.load %arg5[%c0_32, %c0_33, %c0_34] : memref<1x8x32xf32, #tpu.memory_space<vmem>>, vector<1x8x32xf32>
    tpu.vector_store %arg5[%c0_32, %c0_33, %c0_34], %96 {strides = array<i32>} : memref<1x8x32xf32, #tpu.memory_space<vmem>>, vector<1x8x32xf32>,
    return
  }
  func.func @transform_0(%arg0: i32) -> (i32, i32, i32) {
    %c0_i32 = arith.constant 0 : i32
    %c0_i32_0 = arith.constant 0 : i32
    %c0_i32_1 = arith.constant 0 : i32
    return %arg0, %c0_i32, %c0_i32_0 : i32, i32, i32
  }
  func.func @transform_1(%arg0: i32) -> (i32, i32) {
    %c0_i32 = arith.constant 0 : i32
    %c0_i32_0 = arith.constant 0 : i32
    %c0_i32_1 = arith.constant 0 : i32
    return %c0_i32, %c0_i32_0 : i32, i32
  }
  func.func @transform_2(%arg0: i32) -> (i32, i32) {
    %c0_i32 = arith.constant 0 : i32
    %c0_i32_0 = arith.constant 0 : i32
    %c0_i32_1 = arith.constant 0 : i32
    return %c0_i32, %c0_i32_0 : i32, i32
  }
  func.func @transform_3(%arg0: i32) -> (i32, i32) {
    %c0_i32 = arith.constant 0 : i32
    %c0_i32_0 = arith.constant 0 : i32
    %c0_i32_1 = arith.constant 0 : i32
    return %c0_i32, %c0_i32_0 : i32, i32
  }
  func.func @transform_4(%arg0: i32) -> (i32, i32, i32) {
    %c0_i32 = arith.constant 0 : i32
    %c0_i32_0 = arith.constant 0 : i32
    %c0_i32_1 = arith.constant 0 : i32
    return %arg0, %c0_i32, %c0_i32_0 : i32, i32, i32
  }
}

</mosaic_0001>

<bundles_post_ra>
// kernel: tpu_custom_call.1
= control target key start
LH: loop header
LB: loop body
LE: loop exit
PB: predicated region body
PF: predicated region fallthrough
CT: control target
= control target key end

     0   :  { %9 = vsyncpa [#allocation3], 0  ;;  %s1172_s0 = inlined_call_operand.vmem [shape: f32[2,8,32], index: 0, kind: input, shape index: {}]   ;;  %s1173_s1 = inlined_call_operand.vmem [shape: f32[32,384], index: 1, kind: input, shape index: {}]   ;;  %s1174_s2 = inlined_call_operand.vmem [shape: f32[128,32], index: 2, kind: input, shape index: {}]   ;;  %s1175_s3 = inlined_call_operand.vmem [shape: f32[1,32], index: 3, kind: input, shape index: {}]   ;;  %s1176_s4 = inlined_call_operand.hbm [shape: f32[2,8,32], index: 4, kind: output, shape index: {}]  }
   0x1   :  { %11 = vsyncpa [#allocation3 + $0x1], 0  ;;  %s950_s15 = smov 0   ;;  %s952_s16 = smov 0  }
   0x2   :  { %s954_s17 = smov 0   ;;  %s956_s18 = smov 0  }
   0x3 LB: > { %s971_s19 = sadd.s32 4294967295, %s920_s18   ;;  %s770_s20 = sadd.s32 4294967294, %s920_s18   ;;  %s920_s18 = sphi %s956_s18, %s1182_s18   ;;  %s916_s17 = sphi %s954_s17, %s1181_s17   ;;  %s912_s16 = sphi %s952_s16, %s1180_s16   ;;  %s908_s15 = sphi %s950_s15, %s1179_s15  }
   0x4   : > { %s975_s21 = sadd.s32 1, %s920_s18   ;;  %s113_s22 = sadd.s32 1, %s916_s17 }
   0x5   : > { %s110_s23 = ssub.s32 %s920_s18, %s975_s21  ;;  %p123_p0 = scmp.ne.s32.totalorder %s916_s17, %s912_s16 }
   0x6   : > { %p111_p1 = scmp.eq.s32.totalorder %s110_s23, 0  ;;  %p124_p2 = scmp.eq.s32.totalorder %s971_s19, 1 }
   0x7   : > { %p129_p3 = scmp.ne.s32.totalorder %s912_s16, %s908_s15  ;;  %p130_p4 = scmp.eq.s32.totalorder %s770_s20, 1 }
   0x8   : > { %s986_s24 = scalar_select %p111_p1, %s916_s17, %s113_s22  }
   0x9   : > { %p988_p5 = por %p124_p2, %p123_p0  ;;  %p992_p6 = por %p130_p4, %p129_p3 }
   0xa   : > { %p773_p7 = scmp.ge.s32.totalorder %s920_s18, 1  ;;  %p164_p8 = scmp.lt.s32.totalorder %s920_s18, 3 }
   0xc   : > { %p165_p9 = pnand %p773_p7, %p164_p8 }
   0xd   : > { %p189_p10 = scmp.lt.s32.totalorder (!%p165_p9), %s971_s19, 1  ;;  %s922_s5 = smov (!%p165_p9), 64  }
   0xe   : > { %168 = sbr.rel (%p165_p9) target bundleno = 1362 (0x552), region = 36  ;;  %s923_s6 = smov (!%p165_p9), 96  }
   0xf   : > { %s924_s7 = smov (!%p165_p9), 32   ;;  %s186_s20 = sand.u32 (!%p165_p9), 1, %s912_s16  }
  0x13   : > { %v204_v0 = vld [vmem:[%s1173_s1 + $0x50] sm:$0xff]  ;;  %v201_v1 = vld [vmem:[%s1173_s1 + $0x38] sm:$0xff]  ;;  %v203_v2 = vld [vmem:[%s1173_s1 + $0x48] sm:$0xff]  ;;  %s190_s13 = scalar_select %p189_p10, %s971_s19, 1  ;;  %vm206_vm0 = vcmask 261120   ;;  %vm296_vm1 = vcmask 64512  }
  0x14   : > { %242 = vmatpush.msra.mxu1 %v204_v0  ;;  %222 = vmatpush.msra.mxu0 %v203_v2  ;;  %v200_v3 = vld [vmem:[%s1173_s1 + $0x30] sm:$0xff]  ;;  %v198_v4 = vld [vmem:[%s1173_s1 + $0x20] sm:$0xff]  ;;  %v197_v5 = vld [vmem:[%s1173_s1 + $0x18] sm:$0xff] }
  0x15   : > { %v195_v6 = vld [vmem:[%s1173_s1 + $0x8] sm:$0xff]  ;;  %s775_s22 = sshll.u32 %s190_s13, 3  ;;  %v194_v7 = vld [vmem:[%s1173_s1] sm:$0xff]  ;;  %v205_v16 = vld [vmem:[%s1173_s1 + $0x58] sm:$0xff]  ;;  %s878_s13 = scalar_lea.hbm %s1176_s4, 16 }
  0x16   : > { %243 = vmatpush.msra.mxu1 %v201_v1  ;;  %223 = vmatpush.msra.mxu0 %v200_v3  ;;  %s192_s30 = scalar_lea.vmem %s1172_s0, %s775_s22  ;;  %v202_v17 = vld [vmem:[%s1173_s1 + $0x40] sm:$0xff]  ;;  %v199_v18 = vld [vmem:[%s1173_s1 + $0x28] sm:$0xff]  ;;  %v196_v19 = vld [vmem:[%s1173_s1 + $0x10] sm:$0xff]  ;;  %s796_s22 = sshll.u32 %s971_s19, 3 }
  0x17   : > { %v193_v8 = vld [vmem:[%s192_s30] sm:$0xff]  ;;  %262 = vmatpush.msra.mxu2 %v205_v16  ;;  %v347_v29 = vld [vmem:[%s1174_s2 + $0x18] sm:$0xff]  ;;  %v346_v30 = vld [vmem:[%s1174_s2 + $0x10] sm:$0xff]  ;;  %s706_s28 = scalar_lea.hbm %s1176_s4, %s796_s22  ;;  %s696_s19 = scalar_lea.sflag [#allocation3], %s186_s20 }
  0x18   : > { %244 = vmatpush.msra.mxu1 %v198_v4  ;;  %224 = vmatpush.msra.mxu0 %v197_v5  ;;  %v345_v31 = vld [vmem:[%s1174_s2 + $0x8] sm:$0xff]  ;;  %v344_v32 = vld [vmem:[%s1174_s2] sm:$0xff]  ;;  %v430_v16 = vld [vmem:[%s1174_s2 + $0x38] sm:$0xff] }
  0x19   : > { %263 = vmatpush.msra.mxu2 %v202_v17  ;;  %v429_v17 = vld [vmem:[%s1174_s2 + $0x30] sm:$0xff] }
  0x1a   : > { %245 = vmatpush.msra.mxu1 %v195_v6  ;;  %225 = vmatpush.msra.mxu0 %v194_v7 }
  0x1b   : > { %777 = vmatmul.msk.f32.vlgmr.msra.gmra.mxu1 %vm206_vm0, %v193_v8  ;;  %776 = vmatmul.msk.f32.vlgmr.msra.gmra.mxu0 %vm206_vm0, %v193_v8 }
  0x1c   : > { %264 = vmatpush.msra.mxu2 %v199_v18  ;;  %v428_v18 = vld [vmem:[%s1174_s2 + $0x28] sm:$0xff] }
  0x1e   : > { %265 = vmatpush.msra.mxu2 %v196_v19 }
  0x1f   : > { %778 = vmatmul.msk.f32.vlgmr.msra.gmra.mxu2 %vm206_vm0, %v193_v8 }
  0x20   : > { %446 = vmatpush.msrb.mxu2 %v430_v16 }
  0x22   : > { %447 = vmatpush.msrb.mxu2 %v429_v17 }
  0x24   : > { %448 = vmatpush.msrb.mxu2 %v428_v18 }
  0x98   : > { %v247_v9 = vpop.f32.mrf.mxu1  ;;  %v227_v10 = vpop.f32.mrf.mxu0 }
  0x99   : > { %479 = vrot.lane.b32.xlu2 %v247_v9, %s922_s5  ;;  %350 = vrot.lane.b32.xlu1 %v247_v9, %s923_s6 }
  0x9a   : > { %779 = vmatpush.xpose.msk.msra.mxu3 %vm206_vm0, %v247_v9 }
  0x9d   : > { %780 = vmatmul.msk.f32.vlgmr.msra.gmra.mxu3 %vm206_vm0, %v227_v10 }
  0xa1   : > { %585 = vrot.lane.b32.xlu2 %v247_v9, %s924_s7  ;;  %348 = vrot.lane.b32.xlu1 %v227_v10, %s923_s6 }
  0xa2   : > { %v1056_v28 = vpop.f32.mrf.mxu2 }
  0xa3   : > { %339 = vmatpush.msrb.mxu3 %v1056_v28 }
  0xa5   : > { %469 = vmatpush.msra.mxu3 %v347_v29 }
  0xa7   : > { %470 = vmatpush.msra.mxu3 %v346_v30 }
  0xa9   : > { %583 = vrot.lane.b32.xlu1 %v227_v10, %s924_s7  ;;  %471 = vmatpush.msra.mxu3 %v345_v31 }
  0xab   : > { %472 = vmatpush.msra.mxu3 %v344_v32 }
  0xf3   : > { %v480_v12 = vpop.permute.xlu2 %479 }
  0xfb   : > { %v586_v27 = vpop.permute.xlu2 %585 }
 0x10b   : > { %v351_v11 = vpop.permute.xlu1 %350 }
 0x10c   : > { %782 = vmatpush.xpose.msk.msrb.mxu0 %vm206_vm0, %v351_v11 }
 0x110   : > { %787 = vmatpush.xpose.msk.msra.mxu0 %vm206_vm0, %v480_v12 }
 0x113   : > { %v349_v13 = vpop.permute.xlu1 %348 }
 0x114   : > { %783 = vmatmul.msk.f32.vlgmr.msrb.gmra.mxu0 %vm206_vm0, %v349_v13 }
 0x11b   : > { %v584_v54 = vpop.permute.xlu1 %583 }
 0x120   : > { %v293_v14 = vpop.f32.mrf.mxu3 }
 0x121   : > { %v297_v15 = vsel %vm296_vm1, %v293_v14, -inf }
 0x122   : > { %298 = vmax.xlane.f32.xlu0 %v297_v15 }
 0x191   : > { %v373_v20 = vpop.f32.mrf.mxu0 }
 0x192   : > { %v376_v21 = vsel %vm296_vm1, %v373_v20, -inf }
 0x193   : > { %377 = vmax.xlane.f32.xlu2 %v376_v21 }
 0x195   : > { %v299_v22 = vpop.xlane.xlu0 %298 }
 0x196   : > { %v300_v23 = vsub.f32 %v293_v14, %v299_v22  ;;  %v427_v22 = vld [vmem:[%s1174_s2 + $0x20] sm:$0xff] }
 0x197   : > { %449 = vmatpush.msrb.mxu2 %v427_v22 }
 0x198   : > { %v301_v24 = vmul.f32 1.442695, %v300_v23 }
 0x19a   : > { %842 = vpow2.f32 %v301_v24 }
 0x1a0   : > { %v843_v25 = vpop.eup %842 }
 0x1a1   : > { %v303_v26 = vsel %vm296_vm1, %v843_v25, 0.0 }
 0x1a2   : > { %304 = vadd.xlane.f32.xlu0 %v303_v26 }
 0x1b6   : > { %477 = vrot.lane.b32.xlu0 %v227_v10, %s922_s5 }
 0x206   : > { %v378_v33 = vpop.xlane.xlu2 %377 }
 0x207   : > { %v379_v34 = vsub.f32 %v373_v20, %v378_v33 }
 0x209   : > { %v380_v35 = vmul.f32 1.442695, %v379_v34 }
 0x20b   : > { %844 = vpow2.f32 %v380_v35 }
 0x211   : > { %v845_v36 = vpop.eup %844 }
 0x212   : > { %v382_v37 = vsel %vm296_vm1, %v845_v36, 0.0 }
 0x213   : > { %383 = vadd.xlane.f32.xlu2 %v382_v37 }
 0x215   : > { %v305_v38 = vpop.xlane.xlu0 %304 }
 0x216   : > { %846 = vrcp.f32 %v305_v38  ;;  %v317_v42 = vand.u32 2147483648, %v305_v38  ;;  %v315_v44 = vand.u32 2147483647, %v305_v38  ;;  %vm311_vm3 = vweird.f32 %v305_v38 }
 0x218   : > { %v318_v46 = vor.u32 1.1754944e-38, %v317_v42  ;;  %vm316_vm5 = vcmp.eq.f32.partialorder %v315_v44, 8.507059e+37 }
 0x21c   : > { %v847_v39 = vpop.eup %846 }
 0x21d   : > { %v307_v40 = vmul.f32 %v847_v39, %v305_v38  ;;  %vm312_vm2 = vweird.f32 %v847_v39 }
 0x21e   : > { %vm313_vm4 = vmor %vm311_vm3, %vm312_vm2 }
 0x21f   : > { %v308_v41 = vsub.f32 1.0, %v307_v40 }
 0x221   : > { %v309_v43 = vmul.f32 %v847_v39, %v308_v41 }
 0x223   : > { %v310_v45 = vadd.f32 %v847_v39, %v309_v43 }
 0x225   : > { %v314_v47 = vsel %vm313_vm4, %v847_v39, %v310_v45 }
 0x226   : > { %v319_v48 = vsel %vm316_vm5, %v318_v46, %v314_v47 }
 0x227   : > { %v320_v49 = vmul.f32 %v843_v25, %v319_v48  ;;  %v664_v48 = vld [vmem:[%s1174_s2 + $0x78] sm:$0xff] }
 0x228   : > { %v478_v50 = vpop.permute.xlu0 %477 }
 0x229   : > { %781 = vmatmul.msk.f32.vlgmr.msrb.gmra.mxu3 %vm296_vm1, %v320_v49  ;;  %788 = vmatmul.msk.f32.vlgmr.msra.gmra.mxu0 %vm206_vm0, %v478_v50  ;;  %v663_v49 = vld [vmem:[%s1174_s2 + $0x70] sm:$0xff]  ;;  %v558_v50 = vld [vmem:[%s1174_s2 + $0x58] sm:$0xff] }
 0x22a   : > { %791 = vmatpush.xpose.msk.msrb.mxu3 %vm206_vm0, %v586_v27  ;;  %574 = vmatpush.msra.mxu2 %v558_v50 }
 0x286   : > { %v384_v63 = vpop.xlane.xlu2 %383 }
 0x287   : > { %v396_v5 = vand.u32 2147483648, %v384_v63  ;;  %vm390_vm7 = vweird.f32 %v384_v63  ;;  %v394_v6 = vand.u32 2147483647, %v384_v63 }
 0x289   : > { %v397_v9 = vor.u32 1.1754944e-38, %v396_v5  ;;  %vm395_vm9 = vcmp.eq.f32.partialorder %v394_v6, 8.507059e+37 }
 0x2a6   : > { %v502_v51 = vpop.f32.mrf.mxu0 }
 0x2a7   : > { %v505_v52 = vsel %vm296_vm1, %v502_v51, -inf }
 0x2a8   : > { %506 = vmax.xlane.f32.xlu1 %v505_v52  ;;  %v661_v52 = vld [vmem:[%s1174_s2 + $0x60] sm:$0xff] }
 0x2ac   : > { %v341_v53 = vpop.f32.mrf.mxu3 }
 0x2ad   : > { %786 = vmatmul.msk.f32.vlgmr.msra.gmra.mxu3 %vm206_vm0, %v341_v53  ;;  %v557_v53 = vld [vmem:[%s1174_s2 + $0x50] sm:$0xff] }
 0x2ae   : > { %575 = vmatpush.msra.mxu2 %v557_v53 }
 0x2b5   : > { %792 = vmatmul.msk.f32.vlgmr.msrb.gmra.mxu3 %vm206_vm0, %v584_v54  ;;  %v556_v54 = vld [vmem:[%s1174_s2 + $0x48] sm:$0xff] }
 0x2b6   : > { %576 = vmatpush.msra.mxu2 %v556_v54 }
 0x31b   : > { %v507_v55 = vpop.xlane.xlu1 %506 }
 0x31c   : > { %v508_v56 = vsub.f32 %v502_v51, %v507_v55  ;;  %v662_v51 = vld [vmem:[%s1174_s2 + $0x68] sm:$0xff]  ;;  %v555_v55 = vld [vmem:[%s1174_s2 + $0x40] sm:$0xff] }
 0x31d   : > { %577 = vmatpush.msra.mxu2 %v555_v55 }
 0x31e   : > { %v509_v57 = vmul.f32 1.442695, %v508_v56 }
 0x320   : > { %848 = vpow2.f32 %v509_v57 }
 0x321   : > { %850 = vrcp.f32 %v384_v63 }
 0x326   : > { %v1078_v58 = vpop.eup %848 }
 0x327   : > { %v511_v59 = vsel %vm296_vm1, %v1078_v58, 0.0  ;;  %v851_v0 = vpop.eup %850 }
 0x328   : > { %512 = vadd.xlane.f32.xlu2 %v511_v59  ;;  %v386_v1 = vmul.f32 %v851_v0, %v384_v63  ;;  %vm391_vm6 = vweird.f32 %v851_v0  ;;  %v841_v63 = vld [vmem:[%s1175_s3] ss:$0 sm:$0xff] }
 0x329   : > { %vm392_vm8 = vmor %vm390_vm7, %vm391_vm6 }
 0x32a   : > { %v387_v2 = vsub.f32 1.0, %v386_v1 }
 0x32c   : > { %v388_v3 = vmul.f32 %v851_v0, %v387_v2 }
 0x32e   : > { %v389_v4 = vadd.f32 %v851_v0, %v388_v3 }
 0x330   : > { %v1082_v60 = vpop.f32.mrf.mxu3  ;;  %v393_v8 = vsel %vm392_vm8, %v851_v0, %v389_v4 }
 0x331   : > { %v398_v10 = vsel %vm395_vm9, %v397_v9, %v393_v8 }
 0x332   : > { %v399_v12 = vmul.f32 %v845_v36, %v398_v10 }
 0x338   : > { %v608_v61 = vpop.f32.mrf.mxu3 }
 0x339   : > { %v611_v62 = vsel %vm296_vm1, %v608_v61, -inf }
 0x33a   : > { %612 = vmax.xlane.f32.xlu0 %v611_v62 }
 0x340   : > { %401 = vrot.lane.b32.xlu2 %v1056_v28, %s923_s6  ;;  %s710_s6 = sshll.u32 %s706_s28, 4  ;;  %s711_s6 = int_to_ptr.hbm [resolvable:$true] %s710_s6 }
 0x34e   : > { %635 = vrot.lane.b32.xlu0 %v1056_v28, %s924_s7  ;;  %s872_s7 = sshra.s32 %s711_s6, 4  ;;  %s873_s7 = int_to_ptr.hbm [resolvable:$true] %s872_s7 }
 0x34f   : > { %s874_s10 = scalar_lea.hbm %s873_s7, 8  ;;  %p879_p0 = scmp.lt.s32.totalorder %s873_s7, %s1176_s4 }
 0x350   : > { %p875_p11 = scmp.ne.s32.totalorder %s873_s7, %s874_s10  ;;  %p880_p1 = scmp.lt.s32.totalorder %s878_s13, %s874_s10 }
 0x352   : > { %p876_p12 = pnand %p875_p11, %p988_p5  ;;  %p881_p2 = por %p880_p1, %p879_p0 }
 0x354   : > { %p877_p13 = pneg %p876_p12 }
 0x356   : > { %p882_p3 = pnand %p881_p2, %p877_p13 }
 0x39b   : > { %v513_v7 = vpop.xlane.xlu2 %512 }
 0x39c   : > { %v525_v37 = vand.u32 2147483648, %v513_v7  ;;  %vm519_vm14 = vweird.f32 %v513_v7  ;;  %v523_v39 = vand.u32 2147483647, %v513_v7 }
 0x39e   : > { %v526_v44 = vor.u32 1.1754944e-38, %v525_v37  ;;  %vm524_vm3 = vcmp.eq.f32.partialorder %v523_v39, 8.507059e+37 }
 0x3a3   : > { %v402_v11 = vpop.permute.xlu2 %401 }
 0x3a4   : > { %422 = vmatpush.msrb.mxu1 %v402_v11 }
 0x3a5   : > { %784 = vmatmul.msk.f32.vlgmr.msrb.gmra.mxu1 %vm296_vm1, %v399_v12 }
 0x3ad   : > { %v613_v13 = vpop.xlane.xlu0 %612 }
 0x3ae   : > { %v614_v14 = vsub.f32 %v608_v61, %v613_v13 }
 0x3b0   : > { %v615_v15 = vmul.f32 1.442695, %v614_v14 }
 0x3b2   : > { %852 = vpow2.f32 %v615_v15 }
 0x3b3   : > { %854 = vrcp.f32 %v513_v7 }
 0x3b8   : > { %v853_v19 = vpop.eup %852 }
 0x3b9   : > { %v617_v20 = vsel %vm296_vm1, %v853_v19, 0.0  ;;  %v855_v24 = vpop.eup %854 }
 0x3ba   : > { %618 = vadd.xlane.f32.xlu1 %v617_v20  ;;  %v515_v26 = vmul.f32 %v855_v24, %v513_v7  ;;  %vm520_vm11 = vweird.f32 %v855_v24 }
 0x3bb   : > { %vm521_vm2 = vmor %vm519_vm14, %vm520_vm11 }
 0x3bc   : > { %v516_v27 = vsub.f32 1.0, %v515_v26 }
 0x3be   : > { %v517_v31 = vmul.f32 %v855_v24, %v516_v27 }
 0x3c0   : > { %v636_v21 = vpop.permute.xlu0 %635  ;;  %v518_v35 = vadd.f32 %v855_v24, %v517_v31 }
 0x3c1   : > { %656 = vmatpush.msrb.mxu0 %v636_v21 }
 0x3c2   : > { %v522_v42 = vsel %vm521_vm2, %v855_v24, %v518_v35 }
 0x3c3   : > { %v527_v45 = vsel %vm524_vm3, %v526_v44, %v522_v42 }
 0x3c4   : > { %v528_v47 = vmul.f32 %v1078_v58, %v527_v45 }
 0x3d3   : > { %529 = vrot.lane.b32.xlu1 %v1056_v28, %s922_s5  ;;  %s774_s5 = sshll.u32 %s186_s20, 3 }
 0x3d4   : > { %s188_s8 = scalar_lea.vmem [#allocation2], %s774_s5 }
 0x3d5   : > { %s708_s9 = sshll.u32 %s188_s8, 4  ;;  %s709_s9 = int_to_ptr.vmem [resolvable:$true] %s708_s9 }
 0x422   : > { %v424_v23 = vpop.f32.mrf.mxu1 }
 0x423   : > { %785 = vmatmul.msk.f32.vlgmr.msrb.gmra.mxu2 %vm206_vm0, %v424_v23 }
 0x42d   : > { %v619_v25 = vpop.xlane.xlu1 %618 }
 0x42e   : > { %856 = vrcp.f32 %v619_v25  ;;  %v631_v33 = vand.u32 2147483648, %v619_v25  ;;  %v629_v34 = vand.u32 2147483647, %v619_v25  ;;  %vm625_vm12 = vweird.f32 %v619_v25 }
 0x430   : > { %v632_v38 = vor.u32 1.1754944e-38, %v631_v33  ;;  %vm630_vm15 = vcmp.eq.f32.partialorder %v629_v34, 8.507059e+37 }
 0x434   : > { %v857_v29 = vpop.eup %856 }
 0x435   : > { %v621_v30 = vmul.f32 %v857_v29, %v619_v25  ;;  %vm626_vm10 = vweird.f32 %v857_v29 }
 0x436   : > { %vm627_vm13 = vmor %vm625_vm12, %vm626_vm10 }
 0x437   : > { %v622_v32 = vsub.f32 1.0, %v621_v30 }
 0x439   : > { %v623_v28 = vmul.f32 %v857_v29, %v622_v32 }
 0x43b   : > { %v624_v36 = vadd.f32 %v857_v29, %v623_v28 }
 0x43d   : > { %v628_v40 = vsel %vm627_vm13, %v857_v29, %v624_v36 }
 0x43e   : > { %v633_v41 = vsel %vm630_vm15, %v632_v38, %v628_v40 }
 0x43f   : > { %v634_v43 = vmul.f32 %v853_v19, %v633_v41 }
 0x441   : > { %793 = vmatmul.msk.f32.vlgmr.msrb.gmra.mxu0 %vm296_vm1, %v634_v43 }
 0x445   : > { %v530_v46 = vpop.permute.xlu1 %529 }
 0x446   : > { %550 = vmatpush.msra.mxu1 %v530_v46 }
 0x447   : > { %789 = vmatmul.msk.f32.vlgmr.msra.gmra.mxu1 %vm296_vm1, %v528_v47 }
 0x448   : > { %680 = vmatpush.msrb.mxu1 %v664_v48 }
 0x44a   : > { %681 = vmatpush.msrb.mxu1 %v663_v49 }
 0x44c   : > { %682 = vmatpush.msrb.mxu1 %v662_v51 }
 0x44e   : > { %683 = vmatpush.msrb.mxu1 %v661_v52 }
 0x4a6   : > { %v451_v58 = vpop.f32.mrf.mxu2 }
 0x4a7   : > { %v475_v59 = vadd.f32 %v1082_v60, %v451_v58 }
 0x4be   : > { %v658_v56 = vpop.f32.mrf.mxu0 }
 0x4bf   : > { %794 = vmatmul.msk.f32.vlgmr.msrb.gmra.mxu1 %vm206_vm0, %v658_v56 }
 0x4c4   : > { %v552_v57 = vpop.f32.mrf.mxu1 }
 0x4c5   : > { %790 = vmatmul.msk.f32.vlgmr.msra.gmra.mxu2 %vm206_vm0, %v552_v57 }
 0x53c   : > { %v685_v0 = vpop.f32.mrf.mxu1 }
 0x548   : > { %v579_v61 = vpop.f32.mrf.mxu2 }
 0x549   : > { %v582_v62 = vadd.f32 %v579_v61, %v475_v59 }
 0x54b   : > { %v688_v1 = vadd.f32 %v685_v0, %v582_v62 }
 0x54d   : > { %v693_v2 = vadd.f32 %v841_v63, %v688_v1 }
 0x54f   : > { %694 = vst.msk [vmem:[%s188_s8] sm:$0xff] %vm206_vm0, %v693_v2 }
 0x550   : > { %885 = shalt.err (!%p882_p3)
}
 0x551   : > { %799 = dma.vmem_to_hbm [thread:$0]  (%p988_p5), %s709_s9, 128, %s711_s6, %s696_s19  }
 0x552 PF: > { %p805_p4 = scmp.ge.s32.totalorder %s920_s18, 2  ;;  %s722_s20 = sand.u32 1, %s908_s15  }
 0x553   : > { %s723_s22 = scalar_lea.sflag [#allocation3], %s722_s20 }
 0x554   : > { %p802_p7 = pnand %p805_p4, %p992_p6 }
 0x556   : > { %p803_p8 = pneg %p802_p7 }
 0x558   : > { %903 = dma.done.wait (%p803_p8), %s723_s22, 128  }
 0x559   : > { %905 = vsyncadd (%p803_p8), %s723_s22, 4294967168  ;;  %p14_p9 = scmp.ge.s32.totalorder %s975_s21, 4   ;;  %s1179_s15 = smov %s912_s16 }
 0x55a   : > { %s1180_s16 = smov %s916_s17  ;;  %s1181_s17 = smov %s986_s24 }
 0x55b   : > { %s1182_s18 = smov %s975_s21  ;;  %16 = sbr.rel (!%p14_p9) target bundleno = 3 (0x3), region = 71 }
 0x560   :  { %729 = vsyncpa [#allocation3], 1 }
 0x561   :  { %731 = vsyncpa [#allocation3 + $0x1], 1 }

</bundles_post_ra>
